<compile_context>
chip_gen: v5e
topology: v5e:2x2
jax: 0.10.0
libtpu: 0.0.40
codegen_flags: <defaults>
</compile_context>

<pallas_src>
import jax
import jax.numpy as jnp
from jax.experimental import pallas as pl
from jax.experimental.pallas import tpu as pltpu


# ----------------------------------------------------------------------------
# Pallas kernel: full GCN forward, 2-phase row-tiled grid
# ----------------------------------------------------------------------------
def gcn_kernel(x_ref, a_ref, p_ref,
               w1_ref, b1_ref, w2_ref, b2_ref,
               fw1_ref, fb1_ref, fw2_ref, fb2_ref,
               out_ref,
               h1_ref, g_ref):
    f32 = jnp.float32
    bf16 = jnp.bfloat16

    phase = pl.program_id(0)
    j = pl.program_id(1)
    num_tiles = pl.num_programs(1)
    tile = a_ref.shape[0]          # rows of A_hat handled this step (static)

    # ---------------- phase 0: first GCNConv into bf16 h1 scratch -----------
    @pl.when(phase == 0)
    def _phase0():
        a = a_ref[...]                                           # [tile, N] bf16
        x = x_ref[...]                                           # [N, F]    bf16 (pre-normalized)
        # GCNConv 1 reassociated: (A_tile @ x_norm) @ W1 + b1, then ReLU.
        ax = jnp.dot(a, x, preferred_element_type=f32)           # [tile, F]
        h = jnp.dot(ax, w1_ref[...], preferred_element_type=f32) + b1_ref[...]
        h = jnp.maximum(h, 0.0)                                  # dropout = identity (eval)

        row0 = pl.multiple_of(j * tile, 128)
        # NOTE: padded node rows (>= N) end up equal to relu(b1); harmless
        # because the matching A_hat columns and pool columns are zero.
        h1_ref[pl.ds(row0, tile), :] = h.astype(bf16)

    # ---- phase 1: second GCNConv + pooled accumulation (+ head at the end) --
    @pl.when(phase == 1)
    def _phase1():
        @pl.when(j == 0)
        def _init():
            g_ref[...] = jnp.zeros_like(g_ref)

        a = a_ref[...]                                           # [tile, N] bf16
        h1 = h1_ref[...]                                         # [N, 32]   bf16
        # GCNConv 2: (A_tile @ h1) @ W2 + b2
        ah = jnp.dot(a, h1, preferred_element_type=f32)          # [tile, 32]
        h2 = jnp.dot(ah, w2_ref[...], preferred_element_type=f32) + b2_ref[...]

        # global_add_pool as a matmul with the pooling-matrix column slice
        # (pool is 0/1, stored bf16; accumulate in f32).
        pool_t = p_ref[...].astype(f32)                          # [G, tile]
        g_ref[...] += jnp.dot(pool_t, h2, preferred_element_type=f32)

        @pl.when(j == num_tiles - 1)
        def _finalize():
            g = g_ref[...]                                       # [G, 32]
            # fc1 + ReLU
            g = jnp.dot(g, fw1_ref[...], preferred_element_type=f32) + fb1_ref[...]
            g = jnp.maximum(g, 0.0)
            # fc2 (class dim padded to 128 lanes; pad biases are -1e30)
            logits = jnp.dot(g, fw2_ref[...], preferred_element_type=f32) + fb2_ref[...]
            # log_softmax over classes (pad columns vanish: exp(-huge) == 0)
            m = jnp.max(logits, axis=-1, keepdims=True)
            z = logits - m
            lse = jnp.log(jnp.sum(jnp.exp(z), axis=-1, keepdims=True))
            out_ref[...] = z - lse


# ----------------------------------------------------------------------------
# Wrapper: padding, tiling decision, BlockSpecs, grid
# ----------------------------------------------------------------------------
def _round_up(x, m):
    return (x + m - 1) // m * m


# Physical VMEM (per core); fall back to the smallest generation (v7x: 64 MiB).
try:
    _PHYS_VMEM = int(pltpu.get_tpu_info().vmem_capacity_bytes)
except Exception:  # pragma: no cover - query not available on all backends
    _PHYS_VMEM = 64 << 20

_VMEM_BUDGET = int(_PHYS_VMEM * 0.70)   # working-set budget for tile selection
_VMEM_CAP = int(_PHYS_VMEM * 0.85)      # hard cap handed to the compiler


def _vmem_footprint(tile, n_pad, g_pad, F, H, c_pad):
    """Lane-padding-aware VMEM estimate (bytes) for one grid step."""
    lane = lambda n: _round_up(n, 128)
    sub = lambda n: _round_up(n, 8)
    b = 0
    b += 2 * sub(tile) * lane(n_pad) * 2            # A_hat row tile, bf16, 2 bufs
    b += 2 * sub(n_pad) * lane(F) * 2               # x_norm (full), bf16, 2 bufs
    b += 2 * sub(g_pad) * lane(tile) * 2            # pool col tile, bf16, 2 bufs
    b += sub(n_pad) * lane(H) * 2                   # h1 scratch (bf16, lane-padded)
    b += sub(g_pad) * lane(H) * 4                   # pooled accumulator scratch
    b += 2 * sub(g_pad) * lane(c_pad) * 4           # output block
    b += 2 * (sub(F) * lane(H) + 2 * sub(H) * lane(H) + sub(H) * lane(c_pad)
              + 3 * sub(1) * lane(H) + sub(1) * lane(c_pad)) * 4   # weights/biases
    b += 2 << 20                                    # compiler headroom
    return b


def _choose_tiling(N, g_pad, F, H, c_pad):
    # Resident A_hat: one row tile spanning all nodes -> A fetched from HBM once.
    n_res = _round_up(max(N, 8), 128)
    if _vmem_footprint(n_res, n_res, g_pad, F, H, c_pad) <= _VMEM_BUDGET:
        return n_res, n_res
    # Streaming: largest MXU-friendly row tile whose working set fits.
    for t in (1024, 512, 256):
        n_pad = _round_up(N, t)
        if _vmem_footprint(t, n_pad, g_pad, F, H, c_pad) <= _VMEM_BUDGET:
            return t, n_pad
    return 256, _round_up(N, 256)


@jax.jit
def gcn_forward(x, a_hat, pool, params):
    N, F = x.shape
    G = pool.shape[0]
    H = params["w1"].shape[1]
    C = params["fw2"].shape[1]

    g_pad = _round_up(G, 8)
    c_pad = 128
    tile, n_pad = _choose_tiling(N, g_pad, F, H, c_pad)
    num_tiles = n_pad // tile

    # ---- NormalizeFeatures hoisted out of the kernel (exact f32 division) ---
    row_sum = jnp.sum(x, axis=-1, keepdims=True)
    x_norm = (x / jnp.maximum(row_sum, 1.0)).astype(jnp.bfloat16)

    # ---- padding; O(N^2) operands built directly in bf16 --------------------
    xp = jnp.zeros((n_pad, F), jnp.bfloat16).at[:N, :].set(x_norm)
    ap = jnp.zeros((n_pad, n_pad), jnp.bfloat16).at[:N, :N].set(
        a_hat.astype(jnp.bfloat16))
    pp = jnp.zeros((g_pad, n_pad), jnp.bfloat16).at[:G, :N].set(
        pool.astype(jnp.bfloat16))                       # 0/1 -> exact in bf16
    fw2p = jnp.zeros((H, c_pad), jnp.float32).at[:, :C].set(params["fw2"])
    fb2p = jnp.full((1, c_pad), -1e30, jnp.float32).at[:, :C].set(params["fb2"])

    vmem_need = _vmem_footprint(tile, n_pad, g_pad, F, H, c_pad)
    vmem_limit = int(min(max(vmem_need, 16 << 20), _VMEM_CAP))

    def _full(shape):
        return pl.BlockSpec(shape, lambda p, j: (0, 0))

    in_specs = [
        _full((n_pad, F)),                                     # x_norm (bf16, resident)
        pl.BlockSpec((tile, n_pad), lambda p, j: (j, 0)),      # A_hat row tile (bf16)
        # phase 0 pins block 0 (no wasted pool DMA); phase 1 streams col tiles.
        pl.BlockSpec((g_pad, tile), lambda p, j: (0, j * p)),  # pool col tile (bf16)
        _full((F, H)), _full((1, H)),                          # w1, b1
        _full((H, H)), _full((1, H)),                          # w2, b2
        _full((H, H)), _full((1, H)),                          # fw1, fb1
        _full((H, c_pad)), _full((1, c_pad)),                  # fw2 (padded), fb2
    ]
    out_spec = pl.BlockSpec((g_pad, c_pad), lambda p, j: (0, 0))

    out = pl.pallas_call(
        gcn_kernel,
        out_shape=jax.ShapeDtypeStruct((g_pad, c_pad), jnp.float32),
        grid_spec=pltpu.PrefetchScalarGridSpec(
            num_scalar_prefetch=0,
            grid=(2, num_tiles),                # phase-major, row tiles fastest
            in_specs=in_specs,
            out_specs=out_spec,
            scratch_shapes=[
                pltpu.VMEM((n_pad, H), jnp.bfloat16),   # h1 (layer-1 output)
                pltpu.VMEM((g_pad, H), jnp.float32),    # pooled accumulator
            ]),
        compiler_params=pltpu.CompilerParams(
            # phase 1 reads every tile's h1 and accumulates one pooled buffer,
            # so both axes must stay sequential on a single core.
            dimension_semantics=("arbitrary", "arbitrary"),
            vmem_limit_bytes=vmem_limit),
    )(xp, ap, pp,
      params["w1"], params["b1"], params["w2"], params["b2"],
      params["fw1"], params["fb1"], fw2p, fb2p)

    return out[:G, :C]


# ----------------------------------------------------------------------------
# Plain-JAX glue: graph preprocessing and deterministic parameter init
# ----------------------------------------------------------------------------
def build_gcn_adjacency(edge_index, num_nodes):
    """edge_index [2, E] -> dense D^{-1/2} (A + I) D^{-1/2}, float32 [N, N].

    PyG GCNConv aggregates messages at the destination node, i.e. row `dst`
    sums over sources, hence A[dst, src] = 1.
    """
    src, dst = edge_index[0], edge_index[1]
    a = jnp.zeros((num_nodes, num_nodes), jnp.float32)
    a = a.at[dst, src].set(1.0)
    a = a + jnp.eye(num_nodes, dtype=jnp.float32)   # add self loops
    deg = jnp.sum(a, axis=1)
    dinv = jnp.where(deg > 0, 1.0 / jnp.sqrt(deg), 0.0)
    return dinv[:, None] * a * dinv[None, :]


def build_pool_matrix(batch, num_graphs):
    """batch [N] -> one-hot pooling matrix [G, N] for global_add_pool."""
    return jax.nn.one_hot(batch, num_graphs, dtype=jnp.float32).T


def xavier_uniform(key, shape):
    fan_in, fan_out = shape
    bound = jnp.sqrt(6.0 / (fan_in + fan_out))
    return jax.random.uniform(key, shape, jnp.float32, -bound, bound)


def init_params(key, num_node_features, num_classes, hidden=32):
    ks = jax.random.split(key, 4)
    # reset_parameters(): xavier-uniform every param with dim > 1; biases -> 0.
    return {
        "w1": xavier_uniform(ks[0], (num_node_features, hidden)),
        "b1": jnp.zeros((1, hidden), jnp.float32),
        "w2": xavier_uniform(ks[1], (hidden, hidden)),
        "b2": jnp.zeros((1, hidden), jnp.float32),
        "fw1": xavier_uniform(ks[2], (hidden, hidden)),
        "fb1": jnp.zeros((1, hidden), jnp.float32),
        "fw2": xavier_uniform(ks[3], (hidden, num_classes)),
        "fb2": jnp.zeros((1, num_classes), jnp.float32),
    }


# ----------------------------------------------------------------------------
if __name__ == "__main__":
    key = jax.random.PRNGKey(0)
    k_x, k_p = jax.random.split(key)

    num_node_features = 8
    num_classes = 4
    num_nodes = 16          # 2 graphs x 8 nodes
    num_graphs = 2

    # Node features (non-negative, like typical bag-of-words node features).
    x = jnp.abs(jax.random.normal(k_x, (num_nodes, num_node_features), jnp.float32))

    # Deterministic edge_index: a ring inside each graph of 8 nodes (undirected).
    edges = []
    for g in range(num_graphs):
        base = g * 8
        for i in range(8):
            u, v = base + i, base + (i + 1) % 8
            edges.append((u, v))
            edges.append((v, u))
    edge_index = jnp.array(edges, dtype=jnp.int32).T               # [2, E]
    batch = jnp.repeat(jnp.arange(num_graphs, dtype=jnp.int32), 8)  # [N]

    # Preprocess graph structure (glue, plain JAX).
    a_hat = build_gcn_adjacency(edge_index, num_nodes)
    pool = build_pool_matrix(batch, num_graphs)

    # Deterministic parameters.
    params = init_params(k_p, num_node_features, num_classes)

    # TODO(synk): graph_embedding_function hook is a side-effecting Python
    # callback (None by default) with no Pallas equivalent; it is omitted.

    out = gcn_forward(x, a_hat, pool, params)
    jax.block_until_ready(out)

    assert out.shape == (num_graphs, num_classes)
    # log-probs should exponentiate and sum to ~1 per graph
    assert jnp.allclose(jnp.sum(jnp.exp(out), axis=1), 1.0, atol=1e-3)
    print("KERNEL_OK")
</pallas_src>

<mosaic_0001>
module attributes {stable_mosaic.version = 11 : i64} {
  func.func @gcn_kernel(%arg0: i32, %arg1: i32, %arg2: memref<128x8xbf16, #tpu.memory_space<vmem>>, %arg3: memref<128x128xbf16, #tpu.memory_space<vmem>>, %arg4: memref<8x128xbf16, #tpu.memory_space<vmem>>, %arg5: memref<8x32xf32, #tpu.memory_space<vmem>>, %arg6: memref<1x32xf32, #tpu.memory_space<vmem>>, %arg7: memref<32x32xf32, #tpu.memory_space<vmem>>, %arg8: memref<1x32xf32, #tpu.memory_space<vmem>>, %arg9: memref<32x32xf32, #tpu.memory_space<vmem>>, %arg10: memref<1x32xf32, #tpu.memory_space<vmem>>, %arg11: memref<32x128xf32, #tpu.memory_space<vmem>>, %arg12: memref<1x128xf32, #tpu.memory_space<vmem>>, %arg13: memref<8x128xf32, #tpu.memory_space<vmem>>, %arg14: memref<128x32xbf16, #tpu.memory_space<vmem>>, %arg15: memref<8x32xf32, #tpu.memory_space<vmem>>) attributes {dimension_semantics = [#tpu.dimension_semantics<arbitrary>, #tpu.dimension_semantics<arbitrary>], iteration_bounds = array<i64: 2, 1>, scalar_prefetch = 0 : i64, scratch_operands = 2 : i64, tpu.core_type = #tpu.core_type<tc>, window_params = [{pipeline_mode = #tpu.pipeline_mode<synchronous>, transform_indices = @transform_0, window_bounds = array<i64: 128, 8>}, {transform_indices = @transform_1, window_bounds = array<i64: 128, 128>}, {transform_indices = @transform_2, window_bounds = array<i64: 8, 128>}, {pipeline_mode = #tpu.pipeline_mode<synchronous>, transform_indices = @transform_3, window_bounds = array<i64: 8, 32>}, {pipeline_mode = #tpu.pipeline_mode<synchronous>, transform_indices = @transform_4, window_bounds = array<i64: 1, 32>}, {pipeline_mode = #tpu.pipeline_mode<synchronous>, transform_indices = @transform_5, window_bounds = array<i64: 32, 32>}, {pipeline_mode = #tpu.pipeline_mode<synchronous>, transform_indices = @transform_6, window_bounds = array<i64: 1, 32>}, {pipeline_mode = #tpu.pipeline_mode<synchronous>, transform_indices = @transform_7, window_bounds = array<i64: 32, 32>}, {pipeline_mode = #tpu.pipeline_mode<synchronous>, transform_indices = @transform_8, window_bounds = array<i64: 1, 32>}, {pipeline_mode = #tpu.pipeline_mode<synchronous>, transform_indices = @transform_9, window_bounds = array<i64: 32, 128>}, {pipeline_mode = #tpu.pipeline_mode<synchronous>, transform_indices = @transform_10, window_bounds = array<i64: 1, 128>}, {pipeline_mode = #tpu.pipeline_mode<synchronous>, transform_indices = @transform_11, window_bounds = array<i64: 8, 128>}]} {
    %c0_i32 = arith.constant 0 : i32
    %0 = arith.cmpi eq, %arg0, %c0_i32 : i32
    %1 = arith.extui %0 : i1 to i32
    %c0_i32_0 = arith.constant 0 : i32
    %2 = arith.cmpi ne, %1, %c0_i32_0 : i32
    scf.if %2 {
      %c0 = arith.constant 0 : index
      %c0_2 = arith.constant 0 : index
      %6 = vector.load %arg3[%c0, %c0_2] : memref<128x128xbf16, #tpu.memory_space<vmem>>, vector<128x128xbf16>
      %c0_3 = arith.constant 0 : index
      %c0_4 = arith.constant 0 : index
      %7 = vector.load %arg2[%c0_3, %c0_4] : memref<128x8xbf16, #tpu.memory_space<vmem>>, vector<128x8xbf16>
      %cst = arith.constant dense<0.000000e+00> : vector<128x8xf32>
      %8 = tpu.matmul %6, %7, %cst {dimension_numbers = #tpu.dot_dimension_numbers<[1], [0], [0], [1], [0, 0, 1, 1], [], []>} : vector<128x128xbf16>, vector<128x8xbf16>, vector<128x8xf32> -> vector<128x8xf32>
      %c0_5 = arith.constant 0 : index
      %c0_6 = arith.constant 0 : index
      %9 = vector.load %arg5[%c0_5, %c0_6] : memref<8x32xf32, #tpu.memory_space<vmem>>, vector<8x32xf32>
      %cst_7 = arith.constant dense<0.000000e+00> : vector<128x32xf32>
      %10 = tpu.matmul %8, %9, %cst_7 {dimension_numbers = #tpu.dot_dimension_numbers<[1], [0], [0], [1], [0, 0, 1, 1], [], []>} : vector<128x8xf32>, vector<8x32xf32>, vector<128x32xf32> -> vector<128x32xf32>
      %c0_8 = arith.constant 0 : index
      %c0_9 = arith.constant 0 : index
      %11 = vector.load %arg6[%c0_8, %c0_9] : memref<1x32xf32, #tpu.memory_space<vmem>>, vector<1x32xf32>
      %12 = vector.broadcast %11 : vector<1x32xf32> to vector<128x32xf32>
      %13 = arith.addf %10, %12 : vector<128x32xf32>
      %cst_10 = arith.constant 0.000000e+00 : f32
      %14 = vector.broadcast %cst_10 : f32 to vector<128x32xf32>
      %15 = arith.maximumf %13, %14 : vector<128x32xf32>
      %c128_i32 = arith.constant 128 : i32
      %16 = arith.muli %arg1, %c128_i32 : i32
      %17 = tpu.assume_multiple %16, 128 : i32
      %18 = arith.truncf %15 : vector<128x32xf32> to vector<128x32xbf16>
      %19 = arith.index_cast %17 : i32 to index
      %c0_11 = arith.constant 0 : index
      %20 = vector.load %arg14[%19, %c0_11] : memref<128x32xbf16, #tpu.memory_space<vmem>>, vector<128x32xbf16>
      tpu.vector_store %arg14[%19, %c0_11], %18 {strides = array<i32>} : memref<128x32xbf16, #tpu.memory_space<vmem>>, vector<128x32xbf16>,
    } else {
    }
    %c1_i32 = arith.constant 1 : i32
    %3 = arith.cmpi eq, %arg0, %c1_i32 : i32
    %4 = arith.extui %3 : i1 to i32
    %c0_i32_1 = arith.constant 0 : i32
    %5 = arith.cmpi ne, %4, %c0_i32_1 : i32
    scf.if %5 {
      %c0_i32_2 = arith.constant 0 : i32
      %6 = arith.cmpi eq, %arg1, %c0_i32_2 : i32
      %7 = arith.extui %6 : i1 to i32
      %c0_i32_3 = arith.constant 0 : i32
      %8 = arith.cmpi ne, %7, %c0_i32_3 : i32
      scf.if %8 {
        %cst_21 = arith.constant 0.000000e+00 : f32
        %26 = vector.broadcast %cst_21 : f32 to vector<8x32xf32>
        %c0_22 = arith.constant 0 : index
        %c0_23 = arith.constant 0 : index
        %27 = vector.load %arg15[%c0_22, %c0_23] : memref<8x32xf32, #tpu.memory_space<vmem>>, vector<8x32xf32>
        tpu.vector_store %arg15[%c0_22, %c0_23], %26 {strides = array<i32>} : memref<8x32xf32, #tpu.memory_space<vmem>>, vector<8x32xf32>,
      } else {
      }
      %c0 = arith.constant 0 : index
      %c0_4 = arith.constant 0 : index
      %9 = vector.load %arg3[%c0, %c0_4] : memref<128x128xbf16, #tpu.memory_space<vmem>>, vector<128x128xbf16>
      %c0_5 = arith.constant 0 : index
      %c0_6 = arith.constant 0 : index
      %10 = vector.load %arg14[%c0_5, %c0_6] : memref<128x32xbf16, #tpu.memory_space<vmem>>, vector<128x32xbf16>
      %cst = arith.constant dense<0.000000e+00> : vector<128x32xf32>
      %11 = tpu.matmul %9, %10, %cst {dimension_numbers = #tpu.dot_dimension_numbers<[1], [0], [0], [1], [0, 0, 1, 1], [], []>} : vector<128x128xbf16>, vector<128x32xbf16>, vector<128x32xf32> -> vector<128x32xf32>
      %c0_7 = arith.constant 0 : index
      %c0_8 = arith.constant 0 : index
      %12 = vector.load %arg7[%c0_7, %c0_8] : memref<32x32xf32, #tpu.memory_space<vmem>>, vector<32x32xf32>
      %cst_9 = arith.constant dense<0.000000e+00> : vector<128x32xf32>
      %13 = tpu.matmul %11, %12, %cst_9 {dimension_numbers = #tpu.dot_dimension_numbers<[1], [0], [0], [1], [0, 0, 1, 1], [], []>} : vector<128x32xf32>, vector<32x32xf32>, vector<128x32xf32> -> vector<128x32xf32>
      %c0_10 = arith.constant 0 : index
      %c0_11 = arith.constant 0 : index
      %14 = vector.load %arg8[%c0_10, %c0_11] : memref<1x32xf32, #tpu.memory_space<vmem>>, vector<1x32xf32>
      %15 = vector.broadcast %14 : vector<1x32xf32> to vector<128x32xf32>
      %16 = arith.addf %13, %15 : vector<128x32xf32>
      %c0_12 = arith.constant 0 : index
      %c0_13 = arith.constant 0 : index
      %17 = vector.load %arg4[%c0_12, %c0_13] : memref<8x128xbf16, #tpu.memory_space<vmem>>, vector<8x128xbf16>
      %18 = arith.extf %17 : vector<8x128xbf16> to vector<8x128xf32>
      %c0_14 = arith.constant 0 : index
      %c0_15 = arith.constant 0 : index
      %19 = vector.load %arg15[%c0_14, %c0_15] : memref<8x32xf32, #tpu.memory_space<vmem>>, vector<8x32xf32>
      %cst_16 = arith.constant dense<0.000000e+00> : vector<8x32xf32>
      %20 = tpu.matmul %18, %16, %cst_16 {dimension_numbers = #tpu.dot_dimension_numbers<[1], [0], [0], [1], [0, 0, 1, 1], [], []>} : vector<8x128xf32>, vector<128x32xf32>, vector<8x32xf32> -> vector<8x32xf32>
      %21 = arith.addf %19, %20 : vector<8x32xf32>
      %c0_17 = arith.constant 0 : index
      %c0_18 = arith.constant 0 : index
      %22 = vector.load %arg15[%c0_17, %c0_18] : memref<8x32xf32, #tpu.memory_space<vmem>>, vector<8x32xf32>
      tpu.vector_store %arg15[%c0_17, %c0_18], %21 {strides = array<i32>} : memref<8x32xf32, #tpu.memory_space<vmem>>, vector<8x32xf32>,
      %c0_i32_19 = arith.constant 0 : i32
      %23 = arith.cmpi eq, %arg1, %c0_i32_19 : i32
      %24 = arith.extui %23 : i1 to i32
      %c0_i32_20 = arith.constant 0 : i32
      %25 = arith.cmpi ne, %24, %c0_i32_20 : i32
      scf.if %25 {
        %c0_21 = arith.constant 0 : index
        %c0_22 = arith.constant 0 : index
        %26 = vector.load %arg15[%c0_21, %c0_22] : memref<8x32xf32, #tpu.memory_space<vmem>>, vector<8x32xf32>
        %c0_23 = arith.constant 0 : index
        %c0_24 = arith.constant 0 : index
        %27 = vector.load %arg9[%c0_23, %c0_24] : memref<32x32xf32, #tpu.memory_space<vmem>>, vector<32x32xf32>
        %cst_25 = arith.constant dense<0.000000e+00> : vector<8x32xf32>
        %28 = tpu.matmul %26, %27, %cst_25 {dimension_numbers = #tpu.dot_dimension_numbers<[1], [0], [0], [1], [0, 0, 1, 1], [], []>} : vector<8x32xf32>, vector<32x32xf32>, vector<8x32xf32> -> vector<8x32xf32>
        %c0_26 = arith.constant 0 : index
        %c0_27 = arith.constant 0 : index
        %29 = vector.load %arg10[%c0_26, %c0_27] : memref<1x32xf32, #tpu.memory_space<vmem>>, vector<1x32xf32>
        %30 = vector.broadcast %29 : vector<1x32xf32> to vector<8x32xf32>
        %31 = arith.addf %28, %30 : vector<8x32xf32>
        %cst_28 = arith.constant 0.000000e+00 : f32
        %32 = vector.broadcast %cst_28 : f32 to vector<8x32xf32>
        %33 = arith.maximumf %31, %32 : vector<8x32xf32>
        %c0_29 = arith.constant 0 : index
        %c0_30 = arith.constant 0 : index
        %34 = vector.load %arg11[%c0_29, %c0_30] : memref<32x128xf32, #tpu.memory_space<vmem>>, vector<32x128xf32>
        %cst_31 = arith.constant dense<0.000000e+00> : vector<8x128xf32>
        %35 = tpu.matmul %33, %34, %cst_31 {dimension_numbers = #tpu.dot_dimension_numbers<[1], [0], [0], [1], [0, 0, 1, 1], [], []>} : vector<8x32xf32>, vector<32x128xf32>, vector<8x128xf32> -> vector<8x128xf32>
        %c0_32 = arith.constant 0 : index
        %c0_33 = arith.constant 0 : index
        %36 = vector.load %arg12[%c0_32, %c0_33] : memref<1x128xf32, #tpu.memory_space<vmem>>, vector<1x128xf32>
        %37 = vector.broadcast %36 : vector<1x128xf32> to vector<8x128xf32>
        %38 = arith.addf %35, %37 : vector<8x128xf32>
        %cst_34 = arith.constant dense<0xFF800000> : vector<8xf32>
        %39 = vector.multi_reduction <maximumf>, %38, %cst_34 [1] : vector<8x128xf32> to vector<8xf32>
        %40 = vector.shape_cast %39 : vector<8xf32> to vector<8x1xf32>
        %41 = vector.broadcast %40 : vector<8x1xf32> to vector<8x128xf32>
        %42 = arith.subf %38, %41 : vector<8x128xf32>
        %43 = math.exp %42 : vector<8x128xf32>
        %cst_35 = arith.constant dense<0.000000e+00> : vector<8xf32>
        %44 = vector.multi_reduction <add>, %43, %cst_35 [1] : vector<8x128xf32> to vector<8xf32>
        %45 = vector.shape_cast %44 : vector<8xf32> to vector<8x1xf32>
        %46 = math.log %45 : vector<8x1xf32>
        %47 = vector.broadcast %46 : vector<8x1xf32> to vector<8x128xf32>
        %48 = arith.subf %42, %47 : vector<8x128xf32>
        %c0_36 = arith.constant 0 : index
        %c0_37 = arith.constant 0 : index
        %49 = vector.load %arg13[%c0_36, %c0_37] : memref<8x128xf32, #tpu.memory_space<vmem>>, vector<8x128xf32>
        tpu.vector_store %arg13[%c0_36, %c0_37], %48 {strides = array<i32>} : memref<8x128xf32, #tpu.memory_space<vmem>>, vector<8x128xf32>,
      } else {
      }
    } else {
    }
    return
  }
  func.func @transform_0(%arg0: i32, %arg1: i32) -> (i32, i32) {
    %c0_i32 = arith.constant 0 : i32
    %c0_i32_0 = arith.constant 0 : i32
    %c0_i32_1 = arith.constant 0 : i32
    return %c0_i32, %c0_i32_0 : i32, i32
  }
  func.func @transform_1(%arg0: i32, %arg1: i32) -> (i32, i32) {
    %c0_i32 = arith.constant 0 : i32
    %c0_i32_0 = arith.constant 0 : i32
    return %arg1, %c0_i32 : i32, i32
  }
  func.func @transform_2(%arg0: i32, %arg1: i32) -> (i32, i32) {
    %0 = arith.muli %arg1, %arg0 : i32
    %c0_i32 = arith.constant 0 : i32
    %c0_i32_0 = arith.constant 0 : i32
    return %c0_i32, %0 : i32, i32
  }
  func.func @transform_3(%arg0: i32, %arg1: i32) -> (i32, i32) {
    %c0_i32 = arith.constant 0 : i32
    %c0_i32_0 = arith.constant 0 : i32
    %c0_i32_1 = arith.constant 0 : i32
    return %c0_i32, %c0_i32_0 : i32, i32
  }
  func.func @transform_4(%arg0: i32, %arg1: i32) -> (i32, i32) {
    %c0_i32 = arith.constant 0 : i32
    %c0_i32_0 = arith.constant 0 : i32
    %c0_i32_1 = arith.constant 0 : i32
    return %c0_i32, %c0_i32_0 : i32, i32
  }
  func.func @transform_5(%arg0: i32, %arg1: i32) -> (i32, i32) {
    %c0_i32 = arith.constant 0 : i32
    %c0_i32_0 = arith.constant 0 : i32
    %c0_i32_1 = arith.constant 0 : i32
    return %c0_i32, %c0_i32_0 : i32, i32
  }
  func.func @transform_6(%arg0: i32, %arg1: i32) -> (i32, i32) {
    %c0_i32 = arith.constant 0 : i32
    %c0_i32_0 = arith.constant 0 : i32
    %c0_i32_1 = arith.constant 0 : i32
    return %c0_i32, %c0_i32_0 : i32, i32
  }
  func.func @transform_7(%arg0: i32, %arg1: i32) -> (i32, i32) {
    %c0_i32 = arith.constant 0 : i32
    %c0_i32_0 = arith.constant 0 : i32
    %c0_i32_1 = arith.constant 0 : i32
    return %c0_i32, %c0_i32_0 : i32, i32
  }
  func.func @transform_8(%arg0: i32, %arg1: i32) -> (i32, i32) {
    %c0_i32 = arith.constant 0 : i32
    %c0_i32_0 = arith.constant 0 : i32
    %c0_i32_1 = arith.constant 0 : i32
    return %c0_i32, %c0_i32_0 : i32, i32
  }
  func.func @transform_9(%arg0: i32, %arg1: i32) -> (i32, i32) {
    %c0_i32 = arith.constant 0 : i32
    %c0_i32_0 = arith.constant 0 : i32
    %c0_i32_1 = arith.constant 0 : i32
    return %c0_i32, %c0_i32_0 : i32, i32
  }
  func.func @transform_10(%arg0: i32, %arg1: i32) -> (i32, i32) {
    %c0_i32 = arith.constant 0 : i32
    %c0_i32_0 = arith.constant 0 : i32
    %c0_i32_1 = arith.constant 0 : i32
    return %c0_i32, %c0_i32_0 : i32, i32
  }
  func.func @transform_11(%arg0: i32, %arg1: i32) -> (i32, i32) {
    %c0_i32 = arith.constant 0 : i32
    %c0_i32_0 = arith.constant 0 : i32
    %c0_i32_1 = arith.constant 0 : i32
    return %c0_i32, %c0_i32_0 : i32, i32
  }
}

</mosaic_0001>

<bundles_post_ra>
// kernel: gcn_forward.1
= control target key start
LH: loop header
LB: loop body
LE: loop exit
PB: predicated region body
PF: predicated region fallthrough
CT: control target
= control target key end

     0   :  { %s1589_s17 = smov 0   ;;  %s1591_s18 = smov 0   ;;  %s1819_s0 = inlined_call_operand.vmem [shape: bf16[128,8], index: 0, kind: input, shape index: {}]   ;;  %s1820_s1 = inlined_call_operand.vmem [shape: bf16[128,128], index: 1, kind: input, shape index: {}]   ;;  %s1821_s2 = inlined_call_operand.vmem [shape: bf16[8,128], index: 2, kind: input, shape index: {}]   ;;  %s1822_s3 = inlined_call_operand.vmem [shape: f32[8,32], index: 3, kind: input, shape index: {}]   ;;  %s1823_s4 = inlined_call_operand.vmem [shape: f32[1,32], index: 4, kind: input, shape index: {}]   ;;  %s1824_s5 = inlined_call_operand.vmem [shape: f32[32,32], index: 5, kind: input, shape index: {}]   ;;  %s1825_s6 = inlined_call_operand.vmem [shape: f32[1,32], index: 6, kind: input, shape index: {}]   ;;  %s1826_s7 = inlined_call_operand.vmem [shape: f32[32,32], index: 7, kind: input, shape index: {}]   ;;  %s1827_s8 = inlined_call_operand.vmem [shape: f32[1,32], index: 8, kind: input, shape index: {}]   ;;  %s1828_s9 = inlined_call_operand.vmem [shape: f32[32,128], index: 9, kind: input, shape index: {}]   ;;  %s1829_s10 = inlined_call_operand.vmem [shape: f32[1,128], index: 10, kind: input, shape index: {}]   ;;  %s1830_s11 = inlined_call_operand.vmem [shape: f32[8,128], index: 11, kind: output, shape index: {}]  }
   0x1   :  { %s1593_s19 = smov 0  }
   0x2 LB: > { %s33_s20 = sadd.s32 1, %s1522_s18  ;;  %p1235_p0 = scmp.ge.s32.totalorder %s1526_s19, 1  ;;  %s1526_s19 = sphi %s1593_s19, %s21_s19   ;;  %s1522_s18 = sphi %s1591_s18, %s1832_s18   ;;  %s1518_s17 = sphi %s1589_s17, %s1831_s17  }
   0x3   : > { %p35_p1 = scmp.ge.s32.totalorder %s33_s20, 2  ;;  %p358_p2 = scmp.lt.s32.totalorder %s1526_s19, 3 }
   0x5   : > { %s1834_s20 = smov (%p35_p1, %s33_s20), 0  ;;  %p359_p3 = pnand %p1235_p0, %p358_p2 }
   0x6   : > { %p1236_p4 = scmp.ne.s32.totalorder (!%p359_p3), %s1518_s17, 0 }
   0x7   : > { %362 = sbr.rel (%p359_p3) target bundleno = 1453 (0x5ad), region = 64 }
   0xc   : > { %413 = sbr.rel (%p1236_p4) target bundleno = 392 (0x188), region = 68 }
  0x11   : > { %v1417_v0 = vld [vmem:[%s1819_s0 + $0x38] sm:$0xff]  ;;  %v1416_v1 = vld [vmem:[%s1819_s0 + $0x30] sm:$0xff]  ;;  %v1415_v2 = vld [vmem:[%s1819_s0 + $0x28] sm:$0xff]  ;;  %vm596_vm0 = vcmask 64512   ;;  %vm747_vm1 = vcmask 257024  }
  0x12   : > { %542 = vmatpush.bf16.msra.mxu0 %v1417_v0  ;;  %1434 = vmatpush.bf16.msra.mxu2 %v1417_v0  ;;  %v1414_v3 = vld [vmem:[%s1819_s0 + $0x20] sm:$0xff]  ;;  %v1413_v4 = vld [vmem:[%s1819_s0 + $0x18] sm:$0xff]  ;;  %v1412_v5 = vld [vmem:[%s1819_s0 + $0x10] sm:$0xff] }
  0x13   : > { %1435 = vmatpush.bf16.msra.mxu3 %v1417_v0  ;;  %v1411_v6 = vld [vmem:[%s1819_s0 + $0x8] sm:$0xff]  ;;  %v1410_v7 = vld [vmem:[%s1819_s0] sm:$0xff]  ;;  %v1405_v9 = vld [vmem:[%s1820_s1 + $0x18] sm:$0xff] }
  0x14   : > { %v1402_v8 = vld [vmem:[%s1820_s1] sm:$0xff]  ;;  %v1403_v10 = vld [vmem:[%s1820_s1 + $0x8] sm:$0xff]  ;;  %v1409_v12 = vld [vmem:[%s1820_s1 + $0x38] sm:$0xff] }
  0x15   : > { %v1406_v11 = vld [vmem:[%s1820_s1 + $0x20] sm:$0xff]  ;;  %v1404_v13 = vld [vmem:[%s1820_s1 + $0x10] sm:$0xff]  ;;  %v1407_v14 = vld [vmem:[%s1820_s1 + $0x28] sm:$0xff] }
  0x16   : > { %543 = vmatpush.bf16.msra.mxu0 %v1416_v1  ;;  %1436 = vmatpush.bf16.msra.mxu2 %v1416_v1  ;;  %v1408_v15 = vld [vmem:[%s1820_s1 + $0x30] sm:$0xff]  ;;  %v591_v16 = vld [vmem:[%s1822_s3] sm:$0xff] }
  0x17   : > { %1437 = vmatpush.bf16.msra.mxu3 %v1416_v1  ;;  %660 = vmatpush.msra.mxu1 %v591_v16  ;;  %v1680_v33 = vld [vmem:[%s1823_s4] ss:$0 sm:$0xff] }
  0x1a   : > { %544 = vmatpush.bf16.msra.mxu0 %v1415_v2  ;;  %1438 = vmatpush.bf16.msra.mxu2 %v1415_v2 }
  0x1b   : > { %1439 = vmatpush.bf16.msra.mxu3 %v1415_v2 }
  0x1e   : > { %545 = vmatpush.bf16.msra.mxu0 %v1414_v3  ;;  %1440 = vmatpush.bf16.msra.mxu2 %v1414_v3 }
  0x1f   : > { %1441 = vmatpush.bf16.msra.mxu3 %v1414_v3 }
  0x22   : > { %546 = vmatpush.bf16.msra.mxu0 %v1413_v4  ;;  %1442 = vmatpush.bf16.msra.mxu2 %v1413_v4 }
  0x23   : > { %1443 = vmatpush.bf16.msra.mxu3 %v1413_v4 }
  0x26   : > { %547 = vmatpush.bf16.msra.mxu0 %v1412_v5  ;;  %1444 = vmatpush.bf16.msra.mxu2 %v1412_v5 }
  0x27   : > { %1445 = vmatpush.bf16.msra.mxu3 %v1412_v5 }
  0x2a   : > { %548 = vmatpush.bf16.msra.mxu0 %v1411_v6  ;;  %1446 = vmatpush.bf16.msra.mxu2 %v1411_v6 }
  0x2b   : > { %1447 = vmatpush.bf16.msra.mxu3 %v1411_v6 }
  0x2e   : > { %549 = vmatpush.bf16.msra.mxu0 %v1410_v7  ;;  %1448 = vmatpush.bf16.msra.mxu2 %v1410_v7 }
  0x2f   : > { %1449 = vmatpush.bf16.msra.mxu3 %v1410_v7 }
  0x31   : > { %550 = vmatmul.bf16.vlgmr.msra.gmra.mxu0 %v1402_v8  ;;  %565 = vmatmul.bf16.vlgmr.msra.gmra.mxu2 %v1405_v9 }
  0x32   : > { %585 = vmatmul.bf16.vlgmr.msra.gmra.mxu3 %v1409_v12 }
  0x33   : > { %1450 = vmatpush.msrb.mxu3 %v591_v16 }
  0x41   : > { %555 = vmatmul.bf16.gmra.mxu0 %v1403_v10  ;;  %570 = vmatmul.bf16.gmra.mxu2 %v1406_v11 }
  0x51   : > { %560 = vmatmul.bf16.gmra.mxu0 %v1404_v13  ;;  %575 = vmatmul.bf16.gmra.mxu2 %v1407_v14 }
  0x61   : > { %580 = vmatmul.bf16.gmra.mxu2 %v1408_v15 }
  0xae   : > { %v551_v17 = vpop.f32.mrf.mxu0 }
  0xaf   : > { %1301 = vmatmul.msk.f32.vlgmr.msra.gmra.mxu1 %vm596_vm0, %v551_v17 }
  0xb4   : > { %v566_v18 = vpop.f32.mrf.mxu2 }
  0xb5   : > { %v586_v31 = vpop.f32.mrf.mxu3 }
  0xb6   : > { %v553_v19 = vpop.f32.mrf.mxu0 }
  0xb7   : > { %1302 = vmatmul.msk.f32.gmra.mxu1 %vm596_vm0, %v553_v19 }
  0xbc   : > { %v568_v20 = vpop.f32.mrf.mxu2 }
  0xbd   : > { %v588_v32 = vpop.f32.mrf.mxu3 }
  0xbe   : > { %v556_v21 = vpop.f32.mrf.mxu0 }
  0xbf   : > { %1303 = vmatmul.msk.f32.gmra.mxu1 %vm596_vm0, %v556_v21 }
  0xc4   : > { %v571_v22 = vpop.f32.mrf.mxu2 }
  0xc6   : > { %v558_v23 = vpop.f32.mrf.mxu0 }
  0xc7   : > { %1304 = vmatmul.msk.f32.gmra.mxu1 %vm596_vm0, %v558_v23 }
  0xcc   : > { %v573_v24 = vpop.f32.mrf.mxu2 }
  0xce   : > { %v561_v25 = vpop.f32.mrf.mxu0 }
  0xcf   : > { %1305 = vmatmul.msk.f32.gmra.mxu1 %vm596_vm0, %v561_v25 }
  0xd4   : > { %v576_v26 = vpop.f32.mrf.mxu2 }
  0xd5   : > { %1311 = vmatmul.msk.f32.vlgmr.msrb.gmra.mxu3 %vm596_vm0, %v576_v26 }
  0xd6   : > { %v563_v27 = vpop.f32.mrf.mxu0 }
  0xd7   : > { %1306 = vmatmul.msk.f32.gmra.mxu1 %vm596_vm0, %v563_v27 }
  0xdc   : > { %v578_v28 = vpop.f32.mrf.mxu2 }
  0xdd   : > { %1312 = vmatmul.msk.f32.gmra.mxu3 %vm596_vm0, %v578_v28 }
  0xdf   : > { %1307 = vmatmul.msk.f32.gmra.mxu1 %vm596_vm0, %v566_v18 }
  0xe4   : > { %v581_v29 = vpop.f32.mrf.mxu2 }
  0xe5   : > { %1313 = vmatmul.msk.f32.gmra.mxu3 %vm596_vm0, %v581_v29 }
  0xe7   : > { %1308 = vmatmul.msk.f32.gmra.mxu1 %vm596_vm0, %v568_v20 }
  0xec   : > { %v583_v30 = vpop.f32.mrf.mxu2 }
  0xed   : > { %1314 = vmatmul.msk.f32.gmra.mxu3 %vm596_vm0, %v583_v30 }
  0xef   : > { %1309 = vmatmul.msk.f32.gmra.mxu1 %vm596_vm0, %v571_v22 }
  0xf5   : > { %1315 = vmatmul.msk.f32.gmra.mxu3 %vm596_vm0, %v586_v31 }
  0xf7   : > { %1310 = vmatmul.msk.f32.gmra.mxu1 %vm596_vm0, %v573_v24 }
  0xfd   : > { %1316 = vmatmul.msk.f32.gmra.mxu3 %vm596_vm0, %v588_v32 }
 0x12c   : > { %v662_v34 = vpop.f32.mrf.mxu1 }
 0x12d   : > { %v663_v35 = vadd.f32 %v1680_v33, %v662_v34 }
 0x12f   : > { %v710_v36 = vmax.f32 %v663_v35, 0.0 }
 0x131   : > { %v727_v37 = vpack.c.bf16 %v710_v36, %v710_v36 }
 0x133   : > { %748 = vst.msk [vmem:[#allocation2] sm:$0xf] %vm747_vm1, %v727_v37 }
 0x134   : > { %v665_v38 = vpop.f32.mrf.mxu1 }
 0x135   : > { %v666_v39 = vadd.f32 %v1680_v33, %v665_v38 }
 0x137   : > { %v711_v40 = vmax.f32 %v666_v39, 0.0 }
 0x139   : > { %v728_v41 = vpack.c.bf16 %v711_v40, %v711_v40 }
 0x13b   : > { %749 = vst.msk [vmem:[#allocation2 + $0x4] sm:$0xf] %vm747_vm1, %v728_v41 }
 0x13c   : > { %v668_v42 = vpop.f32.mrf.mxu1 }
 0x13d   : > { %v669_v43 = vadd.f32 %v1680_v33, %v668_v42 }
 0x13f   : > { %v712_v44 = vmax.f32 %v669_v43, 0.0 }
 0x141   : > { %v729_v45 = vpack.c.bf16 %v712_v44, %v712_v44 }
 0x143   : > { %750 = vst.msk [vmem:[#allocation2 + $0x8] sm:$0xf] %vm747_vm1, %v729_v45 }
 0x144   : > { %v671_v46 = vpop.f32.mrf.mxu1 }
 0x145   : > { %v672_v47 = vadd.f32 %v1680_v33, %v671_v46 }
 0x147   : > { %v713_v48 = vmax.f32 %v672_v47, 0.0 }
 0x149   : > { %v730_v49 = vpack.c.bf16 %v713_v48, %v713_v48 }
 0x14b   : > { %751 = vst.msk [vmem:[#allocation2 + $0xc] sm:$0xf] %vm747_vm1, %v730_v49 }
 0x14c   : > { %v674_v50 = vpop.f32.mrf.mxu1 }
 0x14d   : > { %v675_v51 = vadd.f32 %v1680_v33, %v674_v50 }
 0x14f   : > { %v714_v52 = vmax.f32 %v675_v51, 0.0 }
 0x151   : > { %v731_v53 = vpack.c.bf16 %v714_v52, %v714_v52 }
 0x153   : > { %752 = vst.msk [vmem:[#allocation2 + $0x10] sm:$0xf] %vm747_vm1, %v731_v53 }
 0x154   : > { %v677_v54 = vpop.f32.mrf.mxu1 }
 0x155   : > { %v678_v55 = vadd.f32 %v1680_v33, %v677_v54 }
 0x157   : > { %v715_v56 = vmax.f32 %v678_v55, 0.0 }
 0x158   : > { %v692_v57 = vpop.f32.mrf.mxu3 }
 0x159   : > { %v732_v58 = vpack.c.bf16 %v715_v56, %v715_v56  ;;  %v693_v59 = vadd.f32 %v1680_v33, %v692_v57 }
 0x15b   : > { %753 = vst.msk [vmem:[#allocation2 + $0x14] sm:$0xf] %vm747_vm1, %v732_v58  ;;  %v720_v60 = vmax.f32 %v693_v59, 0.0 }
 0x15c   : > { %v680_v61 = vpop.f32.mrf.mxu1 }
 0x15d   : > { %v737_v62 = vpack.c.bf16 %v720_v60, %v720_v60  ;;  %v681_v63 = vadd.f32 %v1680_v33, %v680_v61 }
 0x15f   : > { %758 = vst.msk [vmem:[#allocation2 + $0x28] sm:$0xf] %vm747_vm1, %v737_v62  ;;  %v716_v0 = vmax.f32 %v681_v63, 0.0 }
 0x160   : > { %v695_v1 = vpop.f32.mrf.mxu3 }
 0x161   : > { %v733_v2 = vpack.c.bf16 %v716_v0, %v716_v0  ;;  %v696_v3 = vadd.f32 %v1680_v33, %v695_v1 }
 0x163   : > { %754 = vst.msk [vmem:[#allocation2 + $0x18] sm:$0xf] %vm747_vm1, %v733_v2  ;;  %v721_v4 = vmax.f32 %v696_v3, 0.0 }
 0x164   : > { %v683_v5 = vpop.f32.mrf.mxu1 }
 0x165   : > { %v738_v6 = vpack.c.bf16 %v721_v4, %v721_v4  ;;  %v684_v7 = vadd.f32 %v1680_v33, %v683_v5 }
 0x167   : > { %759 = vst.msk [vmem:[#allocation2 + $0x2c] sm:$0xf] %vm747_vm1, %v738_v6  ;;  %v717_v8 = vmax.f32 %v684_v7, 0.0 }
 0x168   : > { %v698_v9 = vpop.f32.mrf.mxu3 }
 0x169   : > { %v734_v10 = vpack.c.bf16 %v717_v8, %v717_v8  ;;  %v699_v11 = vadd.f32 %v1680_v33, %v698_v9 }
 0x16b   : > { %755 = vst.msk [vmem:[#allocation2 + $0x1c] sm:$0xf] %vm747_vm1, %v734_v10  ;;  %v722_v12 = vmax.f32 %v699_v11, 0.0 }
 0x16c   : > { %v686_v13 = vpop.f32.mrf.mxu1 }
 0x16d   : > { %v739_v14 = vpack.c.bf16 %v722_v12, %v722_v12  ;;  %v687_v15 = vadd.f32 %v1680_v33, %v686_v13 }
 0x16f   : > { %760 = vst.msk [vmem:[#allocation2 + $0x30] sm:$0xf] %vm747_vm1, %v739_v14  ;;  %v718_v16 = vmax.f32 %v687_v15, 0.0 }
 0x170   : > { %v701_v17 = vpop.f32.mrf.mxu3 }
 0x171   : > { %v735_v18 = vpack.c.bf16 %v718_v16, %v718_v16  ;;  %v702_v19 = vadd.f32 %v1680_v33, %v701_v17 }
 0x173   : > { %756 = vst.msk [vmem:[#allocation2 + $0x20] sm:$0xf] %vm747_vm1, %v735_v18  ;;  %v723_v20 = vmax.f32 %v702_v19, 0.0 }
 0x174   : > { %v689_v21 = vpop.f32.mrf.mxu1 }
 0x175   : > { %v740_v22 = vpack.c.bf16 %v723_v20, %v723_v20  ;;  %v690_v23 = vadd.f32 %v1680_v33, %v689_v21 }
 0x177   : > { %761 = vst.msk [vmem:[#allocation2 + $0x34] sm:$0xf] %vm747_vm1, %v740_v22  ;;  %v719_v24 = vmax.f32 %v690_v23, 0.0 }
 0x178   : > { %v704_v25 = vpop.f32.mrf.mxu3 }
 0x179   : > { %v736_v26 = vpack.c.bf16 %v719_v24, %v719_v24  ;;  %v705_v27 = vadd.f32 %v1680_v33, %v704_v25 }
 0x17b   : > { %757 = vst.msk [vmem:[#allocation2 + $0x24] sm:$0xf] %vm747_vm1, %v736_v26  ;;  %v724_v28 = vmax.f32 %v705_v27, 0.0 }
 0x17d   : > { %v741_v29 = vpack.c.bf16 %v724_v28, %v724_v28 }
 0x17f   : > { %762 = vst.msk [vmem:[#allocation2 + $0x38] sm:$0xf] %vm747_vm1, %v741_v29 }
 0x180   : > { %v707_v30 = vpop.f32.mrf.mxu3 }
 0x181   : > { %v708_v31 = vadd.f32 %v1680_v33, %v707_v30 }
 0x183   : > { %v725_v32 = vmax.f32 %v708_v31, 0.0 }
 0x185   : > { %v742_v34 = vpack.c.bf16 %v725_v32, %v725_v32 }
 0x187   : > { %763 = vst.msk [vmem:[#allocation2 + $0x3c] sm:$0xf] %vm747_vm1, %v742_v34 }
 0x188 PF: > { %p1317_p5 = scmp.ne.s32.totalorder %s1518_s17, 1 }
 0x18a   : > { %767 = sbr.rel (%p1317_p5) target bundleno = 1453 (0x5ad), region = 72 }
 0x18f   : > { %v1433_v35 = vld [vmem:[#allocation2 + $0x38] sm:$0xff]  ;;  %v1432_v36 = vld [vmem:[#allocation2 + $0x30] sm:$0xff]  ;;  %v1431_v37 = vld [vmem:[#allocation2 + $0x28] sm:$0xff]  ;;  %vm772_vm2 = vcmask 261120   ;;  %v1528_v29 = vmov 0.0  }
 0x190   : > { %902 = vmatpush.bf16.msra.mxu0 %v1433_v35  ;;  %1452 = vmatpush.bf16.msra.mxu3 %v1433_v35  ;;  %v1430_v33 = vld [vmem:[#allocation2 + $0x20] sm:$0xff]  ;;  %v1429_v38 = vld [vmem:[#allocation2 + $0x18] sm:$0xff]  ;;  %v1428_v39 = vld [vmem:[#allocation2 + $0x10] sm:$0xff]  ;;  %773 = vst.msk [vmem:[#allocation3] sm:$0xff] %vm772_vm2, %v1528_v29 }
 0x191   : > { %1451 = vmatpush.bf16.msra.mxu2 %v1433_v35  ;;  %v1427_v40 = vld [vmem:[#allocation2 + $0x8] sm:$0xff]  ;;  %v1426_v41 = vld [vmem:[#allocation2] sm:$0xff]  ;;  %v1424_v45 = vld [vmem:[%s1820_s1 + $0x30] sm:$0xff] }
 0x192   : > { %v1418_v42 = vld [vmem:[%s1820_s1] sm:$0xff]  ;;  %v1423_v43 = vld [vmem:[%s1820_s1 + $0x28] sm:$0xff]  ;;  %v954_v47 = vld [vmem:[%s1824_s5 + $0x18] sm:$0xff] }
 0x193   : > { %v1419_v44 = vld [vmem:[%s1820_s1 + $0x8] sm:$0xff]  ;;  %v1422_v46 = vld [vmem:[%s1820_s1 + $0x20] sm:$0xff]  ;;  %v953_v48 = vld [vmem:[%s1824_s5 + $0x10] sm:$0xff]  ;;  %1020 = vmatpush.msra.mxu1 %v954_v47 }
 0x194   : > { %903 = vmatpush.bf16.msra.mxu0 %v1432_v36  ;;  %1454 = vmatpush.bf16.msra.mxu3 %v1432_v36  ;;  %v952_v49 = vld [vmem:[%s1824_s5 + $0x8] sm:$0xff]  ;;  %v1420_v50 = vld [vmem:[%s1820_s1 + $0x10] sm:$0xff]  ;;  %v1425_v51 = vld [vmem:[%s1820_s1 + $0x38] sm:$0xff] }
 0x195   : > { %1453 = vmatpush.bf16.msra.mxu2 %v1432_v36  ;;  %1021 = vmatpush.msra.mxu1 %v953_v48  ;;  %v1421_v52 = vld [vmem:[%s1820_s1 + $0x18] sm:$0xff]  ;;  %v951_v53 = vld [vmem:[%s1824_s5] sm:$0xff]  ;;  %v1104_v28 = vld [vmem:[%s1826_s7 + $0x10] sm:$0xff] }
 0x196   : > { %v1497_v17 = vld [vmem:[%s1825_s6] ss:$0 sm:$0xff]  ;;  %v1105_v27 = vld [vmem:[%s1826_s7 + $0x18] sm:$0xff]  ;;  %v1103_v30 = vld [vmem:[%s1826_s7 + $0x8] sm:$0xff] }
 0x197   : > { %1022 = vmatpush.msra.mxu1 %v952_v49 }
 0x198   : > { %904 = vmatpush.bf16.msra.mxu0 %v1431_v37  ;;  %1456 = vmatpush.bf16.msra.mxu3 %v1431_v37 }
 0x199   : > { %1455 = vmatpush.bf16.msra.mxu2 %v1431_v37  ;;  %1023 = vmatpush.msra.mxu1 %v951_v53 }
 0x19c   : > { %905 = vmatpush.bf16.msra.mxu0 %v1430_v33  ;;  %1458 = vmatpush.bf16.msra.mxu3 %v1430_v33 }
 0x19d   : > { %1457 = vmatpush.bf16.msra.mxu2 %v1430_v33 }
 0x1a0   : > { %906 = vmatpush.bf16.msra.mxu0 %v1429_v38  ;;  %1460 = vmatpush.bf16.msra.mxu3 %v1429_v38 }
 0x1a1   : > { %1459 = vmatpush.bf16.msra.mxu2 %v1429_v38 }
 0x1a4   : > { %907 = vmatpush.bf16.msra.mxu0 %v1428_v39  ;;  %1462 = vmatpush.bf16.msra.mxu3 %v1428_v39 }
 0x1a5   : > { %1461 = vmatpush.bf16.msra.mxu2 %v1428_v39 }
 0x1a8   : > { %908 = vmatpush.bf16.msra.mxu0 %v1427_v40  ;;  %1464 = vmatpush.bf16.msra.mxu3 %v1427_v40 }
 0x1a9   : > { %1463 = vmatpush.bf16.msra.mxu2 %v1427_v40 }
 0x1ac   : > { %909 = vmatpush.bf16.msra.mxu0 %v1426_v41  ;;  %1466 = vmatpush.bf16.msra.mxu3 %v1426_v41 }
 0x1ad   : > { %1465 = vmatpush.bf16.msra.mxu2 %v1426_v41  ;;  %v1073_v41 = vld [vmem:[%s1821_s2] sm:$0xf] }
 0x1af   : > { %910 = vmatmul.bf16.vlgmr.msra.gmra.mxu0 %v1418_v42  ;;  %935 = vmatmul.bf16.vlgmr.msra.gmra.mxu3 %v1423_v43  ;;  %v1074_v43 = vunpack.c.l.bf16 %v1073_v41 }
 0x1b0   : > { %930 = vmatmul.bf16.vlgmr.msra.gmra.mxu2 %v1422_v46  ;;  %1125 = vmatpush.msrb.mxu3 %v1105_v27  ;;  %v1137_v46 = vld [vmem:[%s1828_s9 + $0x18] sm:$0xff] }
 0x1b1   : > { %1467 = vmatpush.msrb.mxu2 %v954_v47  ;;  %v1075_v47 = vld [vmem:[#allocation3] sm:$0xff] }
 0x1b2   : > { %1126 = vmatpush.msrb.mxu3 %v1104_v28 }
 0x1b3   : > { %1468 = vmatpush.msrb.mxu2 %v953_v48 }
 0x1b4   : > { %1127 = vmatpush.msrb.mxu3 %v1103_v30 }
 0x1b5   : > { %1469 = vmatpush.msrb.mxu2 %v952_v49 }
 0x1b7   : > { %1470 = vmatpush.msrb.mxu2 %v951_v53  ;;  %v1134_v53 = vld [vmem:[%s1828_s9] sm:$0xff] }
 0x1bf   : > { %915 = vmatmul.bf16.gmra.mxu0 %v1419_v44  ;;  %940 = vmatmul.bf16.gmra.mxu3 %v1424_v45  ;;  %v1102_v45 = vld [vmem:[%s1826_s7] sm:$0xff] }
 0x1c0   : > { %1128 = vmatpush.msrb.mxu3 %v1102_v45 }
 0x1c2   : > { %1157 = vmatpush.msra.mxu3 %v1137_v46 }
 0x1cf   : > { %920 = vmatmul.bf16.gmra.mxu0 %v1420_v50  ;;  %945 = vmatmul.bf16.gmra.mxu3 %v1425_v51  ;;  %v1136_v51 = vld [vmem:[%s1828_s9 + $0x10] sm:$0xff] }
 0x1d0   : > { %1158 = vmatpush.msra.mxu3 %v1136_v51 }
 0x1df   : > { %925 = vmatmul.bf16.gmra.mxu0 %v1421_v52  ;;  %v1135_v52 = vld [vmem:[%s1828_s9 + $0x8] sm:$0xff] }
 0x1e0   : > { %1159 = vmatpush.msra.mxu3 %v1135_v52 }
 0x1e2   : > { %1160 = vmatpush.msra.mxu3 %v1134_v53 }
 0x22c   : > { %v911_v54 = vpop.f32.mrf.mxu0 }
 0x22d   : > { %1382 = vmatmul.msk.f32.vlgmr.msra.gmra.mxu1 %vm772_vm2, %v911_v54  ;;  %v1498_v54 = vld [vmem:[%s1827_s8] ss:$0 sm:$0xff] }
 0x232   : > { %v936_v55 = vpop.f32.mrf.mxu3 }
 0x233   : > { %v931_v4 = vpop.f32.mrf.mxu2 }
 0x234   : > { %v913_v56 = vpop.f32.mrf.mxu0 }
 0x235   : > { %1383 = vmatmul.msk.f32.gmra.mxu1 %vm772_vm2, %v913_v56 }
 0x23a   : > { %v938_v57 = vpop.f32.mrf.mxu3 }
 0x23b   : > { %1393 = vmatmul.msk.f32.vlgmr.msrb.gmra.mxu2 %vm772_vm2, %v938_v57  ;;  %v933_v5 = vpop.f32.mrf.mxu2 }
 0x23c   : > { %v916_v58 = vpop.f32.mrf.mxu0 }
 0x23d   : > { %1384 = vmatmul.msk.f32.gmra.mxu1 %vm772_vm2, %v916_v58  ;;  %v1499_v58 = vld [vmem:[%s1829_s10] ss:$0 sm:$0xff] }
 0x242   : > { %v941_v59 = vpop.f32.mrf.mxu3 }
 0x243   : > { %1394 = vmatmul.msk.f32.gmra.mxu2 %vm772_vm2, %v941_v59 }
 0x244   : > { %v918_v60 = vpop.f32.mrf.mxu0 }
 0x245   : > { %1385 = vmatmul.msk.f32.gmra.mxu1 %vm772_vm2, %v918_v60 }
 0x24a   : > { %v943_v61 = vpop.f32.mrf.mxu3 }
 0x24b   : > { %1395 = vmatmul.msk.f32.gmra.mxu2 %vm772_vm2, %v943_v61 }
 0x24c   : > { %v921_v62 = vpop.f32.mrf.mxu0 }
 0x24d   : > { %1386 = vmatmul.msk.f32.gmra.mxu1 %vm772_vm2, %v921_v62 }
 0x252   : > { %v946_v63 = vpop.f32.mrf.mxu3 }
 0x253   : > { %1396 = vmatmul.msk.f32.gmra.mxu2 %vm772_vm2, %v946_v63 }
 0x254   : > { %v923_v0 = vpop.f32.mrf.mxu0 }
 0x255   : > { %1387 = vmatmul.msk.f32.gmra.mxu1 %vm772_vm2, %v923_v0 }
 0x25a   : > { %v948_v1 = vpop.f32.mrf.mxu3 }
 0x25b   : > { %1397 = vmatmul.msk.f32.gmra.mxu2 %vm772_vm2, %v948_v1 }
 0x25c   : > { %v926_v2 = vpop.f32.mrf.mxu0 }
 0x25d   : > { %1388 = vmatmul.msk.f32.gmra.mxu1 %vm772_vm2, %v926_v2 }
 0x264   : > { %v928_v3 = vpop.f32.mrf.mxu0 }
 0x265   : > { %1389 = vmatmul.msk.f32.gmra.mxu1 %vm772_vm2, %v928_v3 }
 0x26d   : > { %1390 = vmatmul.msk.f32.gmra.mxu1 %vm772_vm2, %v931_v4 }
 0x275   : > { %1391 = vmatmul.msk.f32.gmra.mxu1 %vm772_vm2, %v933_v5 }
 0x27d   : > { %1392 = vmatmul.msk.f32.gmra.mxu1 %vm772_vm2, %v936_v55 }
 0x2aa   : > { %v1025_v6 = vpop.f32.mrf.mxu1 }
 0x2ab   : > { %v1026_v44 = vadd.f32 %v1497_v17, %v1025_v6 }
 0x2b2   : > { %v1028_v7 = vpop.f32.mrf.mxu1 }
 0x2b3   : > { %v1029_v42 = vadd.f32 %v1497_v17, %v1028_v7 }
 0x2ba   : > { %v1031_v8 = vpop.f32.mrf.mxu1 }
 0x2bb   : > { %v1032_v40 = vadd.f32 %v1497_v17, %v1031_v8 }
 0x2be   : > { %v1058_v9 = vpop.f32.mrf.mxu2 }
 0x2bf   : > { %v1059_v24 = vadd.f32 %v1497_v17, %v1058_v9 }
 0x2c2   : > { %v1034_v10 = vpop.f32.mrf.mxu1 }
 0x2c3   : > { %v1035_v39 = vadd.f32 %v1497_v17, %v1034_v10 }
 0x2c6   : > { %v1061_v11 = vpop.f32.mrf.mxu2 }
 0x2c7   : > { %v1062_v23 = vadd.f32 %v1497_v17, %v1061_v11 }
 0x2ca   : > { %v1037_v12 = vpop.f32.mrf.mxu1 }
 0x2cb   : > { %v1038_v38 = vadd.f32 %v1497_v17, %v1037_v12 }
 0x2ce   : > { %v1064_v13 = vpop.f32.mrf.mxu2 }
 0x2cf   : > { %v1065_v22 = vadd.f32 %v1497_v17, %v1064_v13 }
 0x2d2   : > { %v1040_v14 = vpop.f32.mrf.mxu1 }
 0x2d3   : > { %v1041_v33 = vadd.f32 %v1497_v17, %v1040_v14 }
 0x2d6   : > { %v1067_v15 = vpop.f32.mrf.mxu2 }
 0x2d7   : > { %v1068_v19 = vadd.f32 %v1497_v17, %v1067_v15 }
 0x2da   : > { %v1043_v16 = vpop.f32.mrf.mxu1 }
 0x2db   : > { %v1044_v37 = vadd.f32 %v1497_v17, %v1043_v16 }
 0x2de   : > { %v1070_v18 = vpop.f32.mrf.mxu2 }
 0x2df   : > { %v1071_v20 = vadd.f32 %v1497_v17, %v1070_v18 }
 0x2e1   : > { %1076 = vmatpush.msra.mxu2 %v1071_v20 }
 0x2e2   : > { %v1046_v21 = vpop.f32.mrf.mxu1 }
 0x2e3   : > { %1077 = vmatpush.msra.mxu2 %v1068_v19  ;;  %v1047_v36 = vadd.f32 %v1497_v17, %v1046_v21 }
 0x2e5   : > { %1078 = vmatpush.msra.mxu2 %v1065_v22 }
 0x2e7   : > { %1079 = vmatpush.msra.mxu2 %v1062_v23 }
 0x2e9   : > { %1080 = vmatpush.msra.mxu2 %v1059_v24 }
 0x2ea   : > { %v1049_v25 = vpop.f32.mrf.mxu1 }
 0x2eb   : > { %v1050_v35 = vadd.f32 %v1497_v17, %v1049_v25 }
 0x2f2   : > { %v1052_v26 = vpop.f32.mrf.mxu1 }
 0x2f3   : > { %v1053_v34 = vadd.f32 %v1497_v17, %v1052_v26 }
 0x2fa   : > { %v1055_v31 = vpop.f32.mrf.mxu1 }
 0x2fb   : > { %v1056_v32 = vadd.f32 %v1497_v17, %v1055_v31 }
 0x2fd   : > { %1081 = vmatpush.msra.mxu2 %v1056_v32 }
 0x2ff   : > { %1082 = vmatpush.msra.mxu2 %v1053_v34 }
 0x301   : > { %1083 = vmatpush.msra.mxu2 %v1050_v35 }
 0x303   : > { %1084 = vmatpush.msra.mxu2 %v1047_v36 }
 0x305   : > { %1085 = vmatpush.msra.mxu2 %v1044_v37 }
 0x307   : > { %1086 = vmatpush.msra.mxu2 %v1041_v33 }
 0x309   : > { %1087 = vmatpush.msra.mxu2 %v1038_v38 }
 0x30b   : > { %1088 = vmatpush.msra.mxu2 %v1035_v39 }
 0x30d   : > { %1089 = vmatpush.msra.mxu2 %v1032_v40 }
 0x30f   : > { %1090 = vmatpush.msra.mxu2 %v1029_v42 }
 0x311   : > { %1091 = vmatpush.msra.mxu2 %v1026_v44 }
 0x312   : > { %1092 = vmatmul.f32.vlgmr.msra.gmra.mxu2 %v1074_v43 }
 0x395   : > { %v1093_v48 = vpop.f32.mrf.mxu2 }
 0x396   : > { %v1096_v49 = vadd.f32 %v1093_v48, %v1075_v47 }
 0x398   : > { %1097 = vst.msk [vmem:[#allocation3] sm:$0xff] %vm772_vm2, %v1096_v49 }
 0x39f   : > { %v1101_v50 = vld [vmem:[#allocation3] sm:$0xff] }
 0x3a0   : > { %1398 = vmatmul.msk.f32.vlgmr.msrb.gmra.mxu3 %vm772_vm2, %v1101_v50 }
 0x423   : > { %v1130_v55 = vpop.f32.mrf.mxu3 }
 0x424   : > { %v1131_v56 = vadd.f32 %v1498_v54, %v1130_v55 }
 0x426   : > { %v1133_v57 = vmax.f32 %v1131_v56, 0.0 }
 0x428   : > { %1399 = vmatmul.msk.f32.vlgmr.msra.gmra.mxu3 %vm772_vm2, %v1133_v57 }
 0x4ab   : > { %v1162_v59 = vpop.f32.mrf.mxu3 }
 0x4ac   : > { %v1163_v60 = vadd.f32 %v1499_v58, %v1162_v59 }
 0x4ae   : > { %1165 = vmax.xlane.f32.xlu0 %v1163_v60 }
 0x521   : > { %v1166_v61 = vpop.xlane.xlu0 %1165 }
 0x522   : > { %v1167_v62 = vsub.f32 %v1163_v60, %v1166_v61 }
 0x524   : > { %v1168_v63 = vmul.f32 1.442695, %v1167_v62 }
 0x526   : > { %1500 = vpow2.f32 %v1168_v63 }
 0x52c   : > { %v1501_v0 = vpop.eup %1500 }
 0x52d   : > { %1170 = vadd.xlane.f32.xlu0 %v1501_v0 }
 0x5a0   : > { %v1171_v1 = vpop.xlane.xlu0 %1170 }
 0x5a1   : > { %1502 = vlog2.f32 %v1171_v1 }
 0x5a7   : > { %v1503_v2 = vpop.eup %1502 }
 0x5a8   : > { %v1173_v3 = vmul.f32 0.6931472, %v1503_v2 }
 0x5aa   : > { %v1174_v4 = vsub.f32 %v1167_v62, %v1173_v3 }
 0x5ac   : > { %1175 = vst [vmem:[%s1830_s11] sm:$0xff] %v1174_v4 }
 0x5ad PF: > { %s21_s19 = sadd.s32 1, %s1526_s19   ;;  %s1831_s17 = smov %s1522_s18 }
 0x5ae   : > { %p18_p6 = scmp.ge.s32.totalorder %s21_s19, 4   ;;  %s1832_s18 = smov %s1834_s20 }
 0x5b0   :  { %20 = sbr.rel (!%p18_p6) target bundleno = 2 (0x2), region = 110 }

</bundles_post_ra>
